<compile_context>
chip_gen: v7x
topology: tpu7x:2x2x1
jax: 0.10.0
libtpu: 0.0.40
codegen_flags: <defaults>
</compile_context>

<pallas_src>
from typing import NamedTuple

import jax
import jax.numpy as jnp
from jax.experimental import pallas as pl
from jax.experimental.pallas import tpu as pltpu

LANE = 128
SUB = 8                                 # rows folded per accumulator group
ROW_ALIGN = 16                          # slab/block row alignment (f32 & bf16 safe)
MAX_BLK_ROWS = 2048                     # 1 MiB per f32 stream per buffer
VMEM_INPUT_BUDGET = 6 * 1024 * 1024     # double-buffered input bytes, all streams
MIN_BLOCKS_FOR_CORE_SPLIT = 4           # only use the 2-core split when >= 4 blocks

# slots inside the embed-moments accumulator block (7 groups of 8 rows)
_M_R2, _M_RG, _M_R, _M_G, _M_G2, _M_MIN, _M_MAX = range(7)
_N_MOMENTS = 7


# ----------------------------------------------------------------------------
# planning helpers (all static python ints)
# ----------------------------------------------------------------------------
def _cdiv(a, b):
    return -(-a // b)


def _round_up(x, m):
    return _cdiv(x, m) * m


def _round_down(x, m):
    return (x // m) * m


class _Plan(NamedTuple):
    nc: int            # leading (core-parallel) grid size
    nb: int            # blocks per core (reduction axis)
    blk: int           # block rows
    padded_rows: int   # nc * nb * blk


def _plan(n_elems, itemsize, n_streams):
    """Pick grid / block rows so that the slab has no partial blocks."""
    rows = _round_up(_cdiv(n_elems, LANE), ROW_ALIGN)
    by_vmem = _round_down(
        VMEM_INPUT_BUDGET // (n_streams * 2 * LANE * itemsize), ROW_ALIGN)
    max_blk = max(ROW_ALIGN, min(MAX_BLK_ROWS, by_vmem))
    nbtot = _cdiv(rows, max_blk)
    nc = 2 if nbtot >= MIN_BLOCKS_FOR_CORE_SPLIT else 1
    nb = _cdiv(nbtot, nc)
    blk = _round_up(_cdiv(rows, nc * nb), ROW_ALIGN)
    return _Plan(nc, nb, blk, nc * nb * blk)


def _flat_input(x):
    """Flatten; keep f32/bf16/f16 as-is (cast happens in-kernel), else -> f32."""
    flat = jnp.ravel(x)
    if (not jnp.issubdtype(flat.dtype, jnp.floating)) or flat.dtype.itemsize > 4:
        flat = flat.astype(jnp.float32)
    return flat


def _to_slab(flat, plan, pad_value=None):
    """View the flat array as a (padded_rows, 128) slab; pad the tail only."""
    total = plan.padded_rows * LANE
    n = flat.shape[0]
    if total != n:
        if pad_value is None:
            flat = jnp.pad(flat, (0, total - n))
        else:
            flat = jnp.concatenate(
                [flat, jnp.full((total - n,), pad_value, flat.dtype)])
    return flat.reshape(plan.padded_rows, LANE)


def _fold_sum(x):
    """(blk, 128) f32 -> (8, 128) partial sum. Tile-aligned reshape, pure VPU."""
    return jnp.sum(x.reshape(-1, SUB, LANE), axis=0)


def _compiler_params():
    return pltpu.CompilerParams(dimension_semantics=("parallel", "arbitrary"))


# ----------------------------------------------------------------------------
# kernel 1: sum of squared differences  (per-core (8,128) partial accumulators)
# ----------------------------------------------------------------------------
def _ssd_kernel(a_ref, b_ref, o_ref):
    @pl.when(pl.program_id(1) == 0)
    def _():
        o_ref[...] = jnp.zeros_like(o_ref)

    d = a_ref[...].astype(jnp.float32) - b_ref[...].astype(jnp.float32)
    o_ref[...] += _fold_sum(d * d)


def _ssd_call(a2d, b2d, plan):
    nc, nb, blk = plan.nc, plan.nb, plan.blk
    in_map = lambda c, j: (c * nb + j, 0)
    out = pl.pallas_call(
        _ssd_kernel,
        out_shape=jax.ShapeDtypeStruct((nc * SUB, LANE), jnp.float32),
        grid=(nc, nb),
        in_specs=[pl.BlockSpec((blk, LANE), in_map),
                  pl.BlockSpec((blk, LANE), in_map)],
        out_specs=pl.BlockSpec((SUB, LANE), lambda c, j: (c, 0)),
        compiler_params=_compiler_params(),
    )(a2d, b2d)
    return jnp.sum(out)


# ----------------------------------------------------------------------------
# kernel 2: fused pair of SSDs (rgb + dynamic branch) in one HBM pass
# ----------------------------------------------------------------------------
def _ssd_pair_kernel(a1_ref, b1_ref, a2_ref, b2_ref, o1_ref, o2_ref):
    @pl.when(pl.program_id(1) == 0)
    def _():
        o1_ref[...] = jnp.zeros_like(o1_ref)
        o2_ref[...] = jnp.zeros_like(o2_ref)

    d1 = a1_ref[...].astype(jnp.float32) - b1_ref[...].astype(jnp.float32)
    d2 = a2_ref[...].astype(jnp.float32) - b2_ref[...].astype(jnp.float32)
    o1_ref[...] += _fold_sum(d1 * d1)
    o2_ref[...] += _fold_sum(d2 * d2)


def _ssd_pair_call(a1, b1, a2, b2, plan):
    nc, nb, blk = plan.nc, plan.nb, plan.blk
    in_map = lambda c, j: (c * nb + j, 0)
    out_spec = pl.BlockSpec((SUB, LANE), lambda c, j: (c, 0))
    o1, o2 = pl.pallas_call(
        _ssd_pair_kernel,
        out_shape=(jax.ShapeDtypeStruct((nc * SUB, LANE), jnp.float32),
                   jax.ShapeDtypeStruct((nc * SUB, LANE), jnp.float32)),
        grid=(nc, nb),
        in_specs=[pl.BlockSpec((blk, LANE), in_map)] * 4,
        out_specs=(out_spec, out_spec),
        compiler_params=_compiler_params(),
    )(a1, b1, a2, b2)
    return jnp.sum(o1), jnp.sum(o2)


# ----------------------------------------------------------------------------
# kernel 3: one-pass moments for the l2_norm embed loss
#   accumulates sum(r^2), sum(r*g), sum(r), sum(g), sum(g^2), min(g), max(g)
#   into a (7*8, 128) accumulator block per core.
# ----------------------------------------------------------------------------
def _embed_moments_kernel(r_ref, g_ref, o_ref):
    @pl.when(pl.program_id(1) == 0)
    def _():
        o_ref[...] = jnp.concatenate(
            [jnp.zeros((5 * SUB, LANE), jnp.float32),
             jnp.full((SUB, LANE), jnp.inf, jnp.float32),
             jnp.full((SUB, LANE), -jnp.inf, jnp.float32)], axis=0)

    r = r_ref[...].astype(jnp.float32)
    g = g_ref[...].astype(jnp.float32)
    g3 = g.reshape(-1, SUB, LANE)

    def sl(k):
        return slice(k * SUB, (k + 1) * SUB)

    o_ref[sl(_M_R2), :] += _fold_sum(r * r)
    o_ref[sl(_M_RG), :] += _fold_sum(r * g)
    o_ref[sl(_M_R), :] += _fold_sum(r)
    o_ref[sl(_M_G), :] += _fold_sum(g)
    o_ref[sl(_M_G2), :] += _fold_sum(g * g)
    o_ref[sl(_M_MIN), :] = jnp.minimum(o_ref[sl(_M_MIN), :], jnp.min(g3, axis=0))
    o_ref[sl(_M_MAX), :] = jnp.maximum(o_ref[sl(_M_MAX), :], jnp.max(g3, axis=0))


def _embed_moments_call(r2d, g2d, plan):
    nc, nb, blk = plan.nc, plan.nb, plan.blk
    in_map = lambda c, j: (c * nb + j, 0)
    out = pl.pallas_call(
        _embed_moments_kernel,
        out_shape=jax.ShapeDtypeStruct((nc * _N_MOMENTS * SUB, LANE), jnp.float32),
        grid=(nc, nb),
        in_specs=[pl.BlockSpec((blk, LANE), in_map),
                  pl.BlockSpec((blk, LANE), in_map)],
        out_specs=pl.BlockSpec((_N_MOMENTS * SUB, LANE), lambda c, j: (c, 0)),
        compiler_params=_compiler_params(),
    )(r2d, g2d)
    return out.reshape(nc, _N_MOMENTS, SUB, LANE)


# ----------------------------------------------------------------------------
# loss primitives (wrappers around the kernels)
# ----------------------------------------------------------------------------
def l2_loss(a, b):
    """mean((a - b)**2), reduction done in the Pallas kernel."""
    af, bf = _flat_input(a), _flat_input(b)
    n = af.shape[0]
    assert bf.shape[0] == n
    plan = _plan(n, max(af.dtype.itemsize, bf.dtype.itemsize), n_streams=2)
    return _ssd_call(_to_slab(af, plan), _to_slab(bf, plan), plan) / jnp.float32(n)


def l2_loss_pair(a1, b1, a2, b2):
    """Two MSEs over same-sized pairs, streamed in a single pallas_call."""
    flats = [_flat_input(t) for t in (a1, b1, a2, b2)]
    n = flats[0].shape[0]
    assert all(t.shape[0] == n for t in flats), "fused pair needs equal sizes"
    plan = _plan(n, max(t.dtype.itemsize for t in flats), n_streams=4)
    slabs = [_to_slab(t, plan) for t in flats]
    s1, s2 = _ssd_pair_call(*slabs, plan)
    inv_n = 1.0 / jnp.float32(n)
    return s1 * inv_n, s2 * inv_n


def psnr_from_mse(mse, max_val=1.0):
    """PSNR_torch from a precomputed MSE: 20*log10(max_val/sqrt(mse)); 100 if 0."""
    safe = jnp.where(mse == 0, jnp.float32(1.0), mse)   # keep grads finite
    val = 20.0 * jnp.log10(max_val / jnp.sqrt(safe))
    return jnp.where(mse == 0, jnp.float32(100.0), val)


def psnr(img1, img2, max_val=1.0):
    return psnr_from_mse(l2_loss(img1, img2), max_val)


def embed_loss_l2_norm(render_embed, gt_embed, eps=1e-12):
    """l2_norm variant of _embed_loss_fn in ONE pass over HBM:

      gt_norm = (gt - min(gt)) / (max(gt) - min(gt) + eps)
      loss    = mean((render - gt_norm)^2)
              = [ Sr2 - 2*inv*(Srg - mn*Sr) + inv^2*(Sg2 - 2*mn*Sg + N*mn^2) ] / N
    """
    rf, gf = _flat_input(render_embed), _flat_input(gt_embed)
    n = rf.shape[0]
    assert gf.shape[0] == n
    plan = _plan(n, max(rf.dtype.itemsize, gf.dtype.itemsize), n_streams=2)
    n_pad = plan.padded_rows * LANE - n
    g0 = gf[0] if n_pad else None          # pad gt with its own first value

    r2d = _to_slab(rf, plan)               # zero pad: Sr, Sr2, Srg unaffected
    g2d = _to_slab(gf, plan, pad_value=g0) # g0 pad: min/max unaffected

    m = _embed_moments_call(r2d, g2d, plan)
    sr2 = jnp.sum(m[:, _M_R2])
    srg = jnp.sum(m[:, _M_RG])
    sr = jnp.sum(m[:, _M_R])
    sg = jnp.sum(m[:, _M_G])
    sg2 = jnp.sum(m[:, _M_G2])
    gmin = jnp.min(m[:, _M_MIN])
    gmax = jnp.max(m[:, _M_MAX])

    if n_pad:  # remove the g0-pad contribution from the gt sums
        g0f = g0.astype(jnp.float32)
        sg = sg - jnp.float32(n_pad) * g0f
        sg2 = sg2 - jnp.float32(n_pad) * g0f * g0f

    inv = 1.0 / (gmax - gmin + eps)
    nn = jnp.float32(n)
    ssd = (sr2
           - 2.0 * inv * (srg - gmin * sr)
           + inv * inv * (sg2 - 2.0 * gmin * sg + nn * gmin * gmin))
    return ssd / nn


# ----------------------------------------------------------------------------
# NeuralRenderer (training forward, loss path)
# ----------------------------------------------------------------------------
class NeuralRendererPallas:
    def __init__(self, cfg):
        self.cfg = cfg
        self.W = cfg["image_width"]
        self.H = cfg["image_height"]
        self.bg_color = cfg["bg_color"]
        self.lambda_embed = cfg["lambda_embed"]
        # NOTE: the torch module parses lambda_rgb but its forward adds loss_rgb
        # unscaled (`loss += loss_rgb`); we mirror that exactly.
        self.lambda_rgb = 1.0 if cfg["lambda_rgb"] is None else cfg["lambda_rgb"]
        self.lambda_dyna = cfg["lambda_dyna"]
        self.warm_up = cfg["warm_up"]
        self.loss_embed_fn = cfg["loss_embed_fn"]
        self.use_dynamic_field = cfg["use_dynamic_field"]
        # TODO(synk): GeneralizableGSEmbedNet / LdmFeatureExtractor weights are
        # cfg-defined external modules; no tensor parameters for the loss path.

    def _embed_loss(self, render_embed, gt_embed):
        if self.loss_embed_fn == "l2_norm":
            return embed_loss_l2_norm(render_embed, gt_embed)
        elif self.loss_embed_fn == "l2":
            return l2_loss(render_embed, gt_embed)
        else:
            raise NotImplementedError(self.loss_embed_fn)

    def forward(self, render_novel, gt_rgb, render_embed=None, gt_embed=None,
                next_render_novel=None, next_gt_rgb=None, step=0):
        """
        render_novel / gt_rgb:              [bs, H, W, 3]  (NHWC)
        render_embed / gt_embed:            [bs, H, W, d_embed]
        next_render_novel / next_gt_rgb:    [bs, H, W, 3]
        Mirrors the `training=True` loss computation of NeuralRenderer.forward.
        """
        dyna_active = (self.use_dynamic_field and next_gt_rgb is not None
                       and next_render_novel is not None)

        if dyna_active:
            # one fused pallas_call streams both image pairs once
            Ll1, loss_dyna = l2_loss_pair(render_novel, gt_rgb,
                                          next_render_novel, next_gt_rgb)
        else:
            Ll1 = l2_loss(render_novel, gt_rgb)
            loss_dyna = jnp.float32(0.0)

        psnr_val = psnr_from_mse(Ll1)        # reuse MSE, no second pass
        loss = Ll1                           # named Ll1 but is MSE, as in torch

        if gt_embed is not None and render_embed is not None:
            loss_embed = self._embed_loss(render_embed, gt_embed)
            loss = loss + self.lambda_embed * loss_embed
        else:
            loss_embed = jnp.float32(0.0)

        if dyna_active:
            if isinstance(step, (int, float)):
                lambda_dyna = self.lambda_dyna if step >= self.warm_up else 0.0
            else:  # traced step (e.g. under jit)
                lambda_dyna = jnp.where(step >= self.warm_up,
                                        self.lambda_dyna, 0.0)
            loss = loss + lambda_dyna * loss_dyna
        loss_reg = jnp.float32(0.0)

        loss_dict = {
            "loss": loss,
            "loss_rgb": Ll1,
            "loss_embed": loss_embed,
            "loss_dyna": loss_dyna,
            "loss_reg": loss_reg,
            "l1": Ll1,
            "psnr": psnr_val,
        }
        ret_dict = {
            "render_novel": render_novel,
            "next_render_novel": next_render_novel,
            "render_embed": render_embed,
            "gt_embed": gt_embed,
        }
        return loss_dict, ret_dict


# ----------------------------------------------------------------------------
# demo / self-check
# ----------------------------------------------------------------------------
def _reference(render_novel, gt_rgb, render_embed, gt_embed,
               next_render_novel, next_gt_rgb, lambda_embed, lambda_dyna):
    mse = jnp.mean((render_novel - gt_rgb) ** 2)
    psnr_ref = 20.0 * jnp.log10(1.0 / jnp.sqrt(mse))
    g = gt_embed
    g_norm = (g - g.min()) / (g.max() - g.min() + 1e-12)
    loss_embed = jnp.mean((render_embed - g_norm) ** 2)
    loss_dyna = jnp.mean((next_render_novel - next_gt_rgb) ** 2)
    loss = mse + lambda_embed * loss_embed + lambda_dyna * loss_dyna
    return loss, mse, loss_embed, loss_dyna, psnr_ref


if __name__ == "__main__":
    cfg = dict(
        image_width=16, image_height=16, bg_color=[0, 0, 0],
        lambda_embed=1.0, lambda_rgb=1.0, lambda_dyna=1.0,
        warm_up=0, loss_embed_fn="l2_norm", use_dynamic_field=True,
        d_embed=4,
    )
    renderer = NeuralRendererPallas(cfg)

    B, H, W, C = 1, 16, 16, 3              # pts2render asserts bs == 1
    d_embed = cfg["d_embed"]
    key = jax.random.PRNGKey(0)
    keys = jax.random.split(key, 6)
    render_novel = jax.random.uniform(keys[0], (B, H, W, C), jnp.float32)
    gt_rgb = jax.random.uniform(keys[1], (B, H, W, C), jnp.float32)
    render_embed = jax.random.uniform(keys[2], (B, H, W, d_embed), jnp.float32)
    gt_embed = jax.random.normal(keys[3], (B, H, W, d_embed), jnp.float32)
    next_render_novel = jax.random.uniform(keys[4], (B, H, W, C), jnp.float32)
    next_gt_rgb = jax.random.uniform(keys[5], (B, H, W, C), jnp.float32)

    loss_dict, ret_dict = renderer.forward(
        render_novel, gt_rgb, render_embed, gt_embed,
        next_render_novel, next_gt_rgb, step=10)
    jax.block_until_ready(loss_dict["loss"])

    ref_loss, ref_mse, ref_embed, ref_dyna, ref_psnr = _reference(
        render_novel, gt_rgb, render_embed, gt_embed,
        next_render_novel, next_gt_rgb,
        cfg["lambda_embed"], cfg["lambda_dyna"])

    assert jnp.allclose(loss_dict["loss_rgb"], ref_mse, rtol=1e-5, atol=1e-6)
    assert jnp.allclose(loss_dict["loss_dyna"], ref_dyna, rtol=1e-5, atol=1e-6)
    assert jnp.allclose(loss_dict["loss_embed"], ref_embed, rtol=1e-3, atol=1e-5)
    assert jnp.allclose(loss_dict["loss"], ref_loss, rtol=1e-3, atol=1e-5)
    assert jnp.allclose(loss_dict["psnr"], ref_psnr, rtol=1e-4, atol=1e-4)

    # extra checks: unaligned sizes exercising (a) a multi-block reduction grid
    # (grid = (1, 2)) and (b) the 2-way core-parallel split (grid = (2, 2)),
    # both with tail padding + analytic pad corrections.
    def _ref_mse(a, b):
        return jnp.mean((a - b) ** 2)

    def _ref_embed(r, g):
        gn = (g - g.min()) / (g.max() - g.min() + 1e-12)
        return jnp.mean((r - gn) ** 2)

    for n_elems, seed in ((300_000, 7), (800_123, 11)):
        ka, kb = jax.random.split(jax.random.PRNGKey(seed))
        xa = jax.random.uniform(ka, (n_elems,), jnp.float32)
        xg = jax.random.normal(kb, (n_elems,), jnp.float32)

        got = l2_loss(xa, xg)
        want = _ref_mse(xa, xg)
        assert jnp.allclose(got, want, rtol=1e-4, atol=1e-6), (n_elems, got, want)

        p1, p2 = l2_loss_pair(xa, xg, xg, xa)
        assert jnp.allclose(p1, want, rtol=1e-4, atol=1e-6), (n_elems, p1, want)
        assert jnp.allclose(p2, want, rtol=1e-4, atol=1e-6), (n_elems, p2, want)

        got_e = embed_loss_l2_norm(xa, xg)
        want_e = _ref_embed(xa, xg)
        assert jnp.allclose(got_e, want_e, rtol=3e-3, atol=1e-5), (
            n_elems, got_e, want_e)

    print("KERNEL_OK")
</pallas_src>

<mosaic_0001>
module attributes {stable_mosaic.version = 11 : i64} {
  func.func @_ssd_pair_kernel(%arg0: i32, %arg1: i32, %arg2: memref<16x128xf32, #tpu.memory_space<vmem>>, %arg3: memref<16x128xf32, #tpu.memory_space<vmem>>, %arg4: memref<16x128xf32, #tpu.memory_space<vmem>>, %arg5: memref<16x128xf32, #tpu.memory_space<vmem>>, %arg6: memref<8x128xf32, #tpu.memory_space<vmem>>, %arg7: memref<8x128xf32, #tpu.memory_space<vmem>>) attributes {dimension_semantics = [#tpu.dimension_semantics<parallel>, #tpu.dimension_semantics<arbitrary>], iteration_bounds = array<i64: 1, 1>, scalar_prefetch = 0 : i64, scratch_operands = 0 : i64, tpu.core_type = #tpu.core_type<tc>, window_params = [{transform_indices = @transform_0, window_bounds = array<i64: 16, 128>}, {transform_indices = @transform_1, window_bounds = array<i64: 16, 128>}, {transform_indices = @transform_2, window_bounds = array<i64: 16, 128>}, {transform_indices = @transform_3, window_bounds = array<i64: 16, 128>}, {transform_indices = @transform_4, window_bounds = array<i64: 8, 128>}, {transform_indices = @transform_5, window_bounds = array<i64: 8, 128>}]} {
    %c0_i32 = arith.constant 0 : i32
    %0 = arith.cmpi eq, %arg1, %c0_i32 : i32
    %1 = arith.extui %0 : i1 to i32
    %c0_i32_0 = arith.constant 0 : i32
    %2 = arith.cmpi ne, %1, %c0_i32_0 : i32
    scf.if %2 {
      %cst_17 = arith.constant 0.000000e+00 : f32
      %21 = vector.broadcast %cst_17 : f32 to vector<8x128xf32>
      %c0_18 = arith.constant 0 : index
      %c0_19 = arith.constant 0 : index
      %22 = vector.load %arg6[%c0_18, %c0_19] : memref<8x128xf32, #tpu.memory_space<vmem>>, vector<8x128xf32>
      tpu.vector_store %arg6[%c0_18, %c0_19], %21 {strides = array<i32>} : memref<8x128xf32, #tpu.memory_space<vmem>>, vector<8x128xf32>,
      %cst_20 = arith.constant 0.000000e+00 : f32
      %23 = vector.broadcast %cst_20 : f32 to vector<8x128xf32>
      %c0_21 = arith.constant 0 : index
      %c0_22 = arith.constant 0 : index
      %24 = vector.load %arg7[%c0_21, %c0_22] : memref<8x128xf32, #tpu.memory_space<vmem>>, vector<8x128xf32>
      tpu.vector_store %arg7[%c0_21, %c0_22], %23 {strides = array<i32>} : memref<8x128xf32, #tpu.memory_space<vmem>>, vector<8x128xf32>,
    } else {
    }
    %c0 = arith.constant 0 : index
    %c0_1 = arith.constant 0 : index
    %3 = vector.load %arg2[%c0, %c0_1] : memref<16x128xf32, #tpu.memory_space<vmem>>, vector<16x128xf32>
    %c0_2 = arith.constant 0 : index
    %c0_3 = arith.constant 0 : index
    %4 = vector.load %arg3[%c0_2, %c0_3] : memref<16x128xf32, #tpu.memory_space<vmem>>, vector<16x128xf32>
    %5 = arith.subf %3, %4 : vector<16x128xf32>
    %c0_4 = arith.constant 0 : index
    %c0_5 = arith.constant 0 : index
    %6 = vector.load %arg4[%c0_4, %c0_5] : memref<16x128xf32, #tpu.memory_space<vmem>>, vector<16x128xf32>
    %c0_6 = arith.constant 0 : index
    %c0_7 = arith.constant 0 : index
    %7 = vector.load %arg5[%c0_6, %c0_7] : memref<16x128xf32, #tpu.memory_space<vmem>>, vector<16x128xf32>
    %8 = arith.subf %6, %7 : vector<16x128xf32>
    %c0_8 = arith.constant 0 : index
    %c0_9 = arith.constant 0 : index
    %9 = vector.load %arg6[%c0_8, %c0_9] : memref<8x128xf32, #tpu.memory_space<vmem>>, vector<8x128xf32>
    %10 = arith.mulf %5, %5 : vector<16x128xf32>
    %11 = vector.shape_cast %10 : vector<16x128xf32> to vector<2x8x128xf32>
    %cst = arith.constant dense<0.000000e+00> : vector<8x128xf32>
    %12 = vector.multi_reduction <add>, %11, %cst [0] : vector<2x8x128xf32> to vector<8x128xf32>
    %13 = arith.addf %9, %12 : vector<8x128xf32>
    %c0_10 = arith.constant 0 : index
    %c0_11 = arith.constant 0 : index
    %14 = vector.load %arg6[%c0_10, %c0_11] : memref<8x128xf32, #tpu.memory_space<vmem>>, vector<8x128xf32>
    tpu.vector_store %arg6[%c0_10, %c0_11], %13 {strides = array<i32>} : memref<8x128xf32, #tpu.memory_space<vmem>>, vector<8x128xf32>,
    %c0_12 = arith.constant 0 : index
    %c0_13 = arith.constant 0 : index
    %15 = vector.load %arg7[%c0_12, %c0_13] : memref<8x128xf32, #tpu.memory_space<vmem>>, vector<8x128xf32>
    %16 = arith.mulf %8, %8 : vector<16x128xf32>
    %17 = vector.shape_cast %16 : vector<16x128xf32> to vector<2x8x128xf32>
    %cst_14 = arith.constant dense<0.000000e+00> : vector<8x128xf32>
    %18 = vector.multi_reduction <add>, %17, %cst_14 [0] : vector<2x8x128xf32> to vector<8x128xf32>
    %19 = arith.addf %15, %18 : vector<8x128xf32>
    %c0_15 = arith.constant 0 : index
    %c0_16 = arith.constant 0 : index
    %20 = vector.load %arg7[%c0_15, %c0_16] : memref<8x128xf32, #tpu.memory_space<vmem>>, vector<8x128xf32>
    tpu.vector_store %arg7[%c0_15, %c0_16], %19 {strides = array<i32>} : memref<8x128xf32, #tpu.memory_space<vmem>>, vector<8x128xf32>,
    return
  }
  func.func @transform_0(%arg0: i32, %arg1: i32) -> (i32, i32) {
    %c1_i32 = arith.constant 1 : i32
    %0 = arith.muli %arg0, %c1_i32 : i32
    %1 = arith.addi %0, %arg1 : i32
    %c0_i32 = arith.constant 0 : i32
    %c0_i32_0 = arith.constant 0 : i32
    return %1, %c0_i32 : i32, i32
  }
  func.func @transform_1(%arg0: i32, %arg1: i32) -> (i32, i32) {
    %c1_i32 = arith.constant 1 : i32
    %0 = arith.muli %arg0, %c1_i32 : i32
    %1 = arith.addi %0, %arg1 : i32
    %c0_i32 = arith.constant 0 : i32
    %c0_i32_0 = arith.constant 0 : i32
    return %1, %c0_i32 : i32, i32
  }
  func.func @transform_2(%arg0: i32, %arg1: i32) -> (i32, i32) {
    %c1_i32 = arith.constant 1 : i32
    %0 = arith.muli %arg0, %c1_i32 : i32
    %1 = arith.addi %0, %arg1 : i32
    %c0_i32 = arith.constant 0 : i32
    %c0_i32_0 = arith.constant 0 : i32
    return %1, %c0_i32 : i32, i32
  }
  func.func @transform_3(%arg0: i32, %arg1: i32) -> (i32, i32) {
    %c1_i32 = arith.constant 1 : i32
    %0 = arith.muli %arg0, %c1_i32 : i32
    %1 = arith.addi %0, %arg1 : i32
    %c0_i32 = arith.constant 0 : i32
    %c0_i32_0 = arith.constant 0 : i32
    return %1, %c0_i32 : i32, i32
  }
  func.func @transform_4(%arg0: i32, %arg1: i32) -> (i32, i32) {
    %c0_i32 = arith.constant 0 : i32
    %c0_i32_0 = arith.constant 0 : i32
    return %arg0, %c0_i32 : i32, i32
  }
  func.func @transform_5(%arg0: i32, %arg1: i32) -> (i32, i32) {
    %c0_i32 = arith.constant 0 : i32
    %c0_i32_0 = arith.constant 0 : i32
    return %arg0, %c0_i32 : i32, i32
  }
}

</mosaic_0001>

<bundles_post_ra>
// kernel: tpu_custom_call.1
= control target key start
LH: loop header
LB: loop body
LE: loop exit
PB: predicated region body
PF: predicated region fallthrough
CT: control target
= control target key end

     0   :  { %11 = vsyncpa [#allocation3], 0  ;;  %s448_s0 = inlined_call_operand.hbm [shape: f32[16,128], index: 0, kind: input, shape index: {}]   ;;  %s449_s1 = inlined_call_operand.hbm [shape: f32[16,128], index: 1, kind: input, shape index: {}]   ;;  %s450_s2 = inlined_call_operand.hbm [shape: f32[16,128], index: 2, kind: input, shape index: {}]   ;;  %s451_s3 = inlined_call_operand.hbm [shape: f32[16,128], index: 3, kind: input, shape index: {}]   ;;  %s452_s4 = inlined_call_operand.hbm [shape: f32[8,128], index: 4, kind: output, shape index: {0}]   ;;  %s453_s5 = inlined_call_operand.hbm [shape: f32[8,128], index: 5, kind: output, shape index: {1}]  }
   0x1   :  { %12 = vsyncpa [#allocation6], 0 }
   0x2   :  { %13 = vsyncpa [#allocation9], 0 }
   0x3   :  { %14 = vsyncpa [#allocation4], 0 }
   0x4   :  { %15 = vsyncpa [#allocation12], 0  ;;  %s312_s18 = smov [#allocation5]   ;;  %s313_s20 = smov [#allocation2]  }
   0x5   :  { %s41_s19 = sshll.u32 %s312_s18, 4  ;;  %s25_s21 = sshll.u32 %s313_s20, 4  ;;  %s42_s19 = int_to_ptr.vmem [resolvable:$true] %s41_s19  ;;  %s350_s21 = int_to_ptr.vmem [resolvable:$true] %s25_s21 }
   0x6   :  { %s170_s24 = scalar_lea.hbm %s449_s1, 256 }
   0x7   :  { %p171_p0 = scmp.ne.s32.totalorder %s449_s1, %s170_s24  ;;  %p174_p1 = scmp.lt.u32.totalorder %s170_s24, %s449_s1 }
   0x9   :  { %p176_p2 = pnand %p174_p1, %p171_p0 }
   0xb   :  { %179 = shalt.err (!%p176_p2)
}
   0xc   :  { %s180_s29 = scalar_lea.vmem %s42_s19, 256  ;;  %p185_p4 = scmp.lt.s32.totalorder %s42_s19, %s42_s19 }
   0xd   :  { %p181_p3 = scmp.ne.s32.totalorder %s42_s19, %s180_s29  ;;  %p186_p5 = scmp.lt.s32.totalorder %s180_s29, %s180_s29 }
   0xf   :  { %p187_p6 = por %p186_p5, %p185_p4 }
  0x11   :  { %p188_p7 = pnand %p187_p6, %p181_p3 }
  0x13   :  { %191 = shalt.err (!%p188_p7)
}
  0x14   :  { %s314_s30 = smov 128   ;;  %s315_s6 = smov 8  }
  0x15   :  { %47 = dma.hbm_to_vmem [thread:$0]  %s449_s1, 256, %s42_s19, [#allocation6], %s314_s30, %s314_s30, %s315_s6  }
  0x16   :  { %s192_s11 = scalar_lea.hbm %s448_s0, 256 }
  0x17   :  { %p193_p8 = scmp.ne.s32.totalorder %s448_s0, %s192_s11  ;;  %p196_p9 = scmp.lt.u32.totalorder %s192_s11, %s448_s0 }
  0x19   :  { %p198_p10 = pnand %p196_p9, %p193_p8 }
  0x1b   :  { %201 = shalt.err (!%p198_p10)
}
  0x1c   :  { %s202_s16 = scalar_lea.vmem %s350_s21, 256  ;;  %p207_p12 = scmp.lt.s32.totalorder %s350_s21, %s350_s21 }
  0x1d   :  { %p203_p11 = scmp.ne.s32.totalorder %s350_s21, %s202_s16  ;;  %p208_p13 = scmp.lt.s32.totalorder %s202_s16, %s202_s16 }
  0x1f   :  { %p209_p0 = por %p208_p13, %p207_p12 }
  0x21   :  { %p210_p1 = pnand %p209_p0, %p203_p11 }
  0x23   :  { %213 = shalt.err (!%p210_p1)
}
  0x24   :  { %31 = dma.hbm_to_vmem [thread:$0]  %s448_s0, 256, %s350_s21, [#allocation3], %s314_s30, %s314_s30, %s315_s6  }
  0x25   :  { %s316_s18 = smov [#allocation7]   ;;  %s317_s20 = smov [#allocation8]  }
  0x26   :  { %s57_s19 = sshll.u32 %s316_s18, 4  ;;  %s73_s22 = sshll.u32 %s317_s20, 4  ;;  %s58_s19 = int_to_ptr.vmem [resolvable:$true] %s57_s19  ;;  %s387_s22 = int_to_ptr.vmem [resolvable:$true] %s73_s22 }
  0x27   :  { %s214_s25 = scalar_lea.hbm %s450_s2, 256 }
  0x28   :  { %p215_p2 = scmp.ne.s32.totalorder %s450_s2, %s214_s25  ;;  %p218_p3 = scmp.lt.u32.totalorder %s214_s25, %s450_s2 }
  0x2a   :  { %p220_p4 = pnand %p218_p3, %p215_p2 }
  0x2c   :  { %223 = shalt.err (!%p220_p4)
}
  0x2d   :  { %s224_s0 = scalar_lea.vmem %s58_s19, 256  ;;  %p229_p6 = scmp.lt.s32.totalorder %s58_s19, %s58_s19 }
  0x2e   :  { %p225_p5 = scmp.ne.s32.totalorder %s58_s19, %s224_s0  ;;  %p230_p7 = scmp.lt.s32.totalorder %s224_s0, %s224_s0 }
  0x30   :  { %p231_p8 = por %p230_p7, %p229_p6 }
  0x32   :  { %p232_p9 = pnand %p231_p8, %p225_p5 }
  0x34   :  { %235 = shalt.err (!%p232_p9)
}
  0x35   :  { %63 = dma.hbm_to_vmem [thread:$0]  %s450_s2, 256, %s58_s19, [#allocation6], %s314_s30, %s314_s30, %s315_s6  }
  0x36   :  { %s236_s10 = scalar_lea.hbm %s451_s3, 256 }
  0x37   :  { %p237_p10 = scmp.ne.s32.totalorder %s451_s3, %s236_s10  ;;  %p240_p11 = scmp.lt.u32.totalorder %s236_s10, %s451_s3 }
  0x39   :  { %p242_p12 = pnand %p240_p11, %p237_p10 }
  0x3b   :  { %245 = shalt.err (!%p242_p12)
}
  0x3c   :  { %s246_s15 = scalar_lea.vmem %s387_s22, 256  ;;  %p251_p0 = scmp.lt.s32.totalorder %s387_s22, %s387_s22 }
  0x3d   :  { %p247_p13 = scmp.ne.s32.totalorder %s387_s22, %s246_s15  ;;  %p252_p1 = scmp.lt.s32.totalorder %s246_s15, %s246_s15 }
  0x3f   :  { %p253_p2 = por %p252_p1, %p251_p0 }
  0x41   :  { %p254_p3 = pnand %p253_p2, %p247_p13 }
  0x43   :  { %257 = shalt.err (!%p254_p3)
}
  0x44   :  { %79 = dma.hbm_to_vmem [thread:$0]  %s451_s3, 256, %s387_s22, [#allocation9], %s314_s30, %s314_s30, %s315_s6  }
  0x45   :  { %302 = dma.done.wait [#allocation3], 256  }
  0x46   :  { %303 = vsyncadd [#allocation3], 4294967040 }
  0x47   :  { %304 = dma.done.wait [#allocation6], 512  }
  0x48   :  { %305 = vsyncadd [#allocation6], 4294966784 }
  0x49   :  { %306 = dma.done.wait [#allocation9], 256  }
  0x4a   :  { %307 = vsyncadd [#allocation9], 4294967040  ;;  %v106_v0 = vld [vmem:[#allocation2] sm:$0xff]  ;;  %v107_v1 = vld [vmem:[#allocation2 + $0x8] sm:$0xff]  ;;  %s318_s3 = smov [#allocation10]   ;;  %s319_s6 = smov [#allocation11]  }
  0x4b   :  { %v108_v2 = vld [vmem:[#allocation5] sm:$0xff]  ;;  %v109_v3 = vld [vmem:[#allocation5 + $0x8] sm:$0xff]  ;;  %v112_v5 = vld [vmem:[#allocation7] sm:$0xff]  ;;  %s136_s30 = sshll.u32 %s318_s3, 4  ;;  %s146_s1 = sshll.u32 %s319_s6, 4  ;;  %s137_s30 = int_to_ptr.vmem [resolvable:$true] %s136_s30  ;;  %s147_s1 = int_to_ptr.vmem [resolvable:$true] %s146_s1 }
  0x4c   :  { %v110_v4 = vsub.f32 %v106_v0, %v108_v2  ;;  %v113_v6 = vld [vmem:[#allocation7 + $0x8] sm:$0xff]  ;;  %v111_v7 = vsub.f32 %v107_v1, %v109_v3  ;;  %v114_v8 = vld [vmem:[#allocation8] sm:$0xff]  ;;  %v115_v9 = vld [vmem:[#allocation8 + $0x8] sm:$0xff]  ;;  %s258_s17 = scalar_lea.vmem %s137_s30, 128  ;;  %p263_p5 = scmp.lt.s32.totalorder %s137_s30, %s137_s30 }
  0x4d   :  { %v116_v11 = vsub.f32 %v112_v5, %v114_v8  ;;  %v117_v12 = vsub.f32 %v113_v6, %v115_v9  ;;  %p259_p4 = scmp.ne.s32.totalorder %s137_s30, %s258_s17  ;;  %p264_p6 = scmp.lt.s32.totalorder %s258_s17, %s258_s17 }
  0x4e   :  { %v119_v10 = vmul.f32 %v110_v4, %v110_v4  ;;  %v120_v13 = vmul.f32 %v111_v7, %v111_v7 }
  0x4f   :  { %v125_v14 = vmul.f32 %v116_v11, %v116_v11  ;;  %v126_v15 = vmul.f32 %v117_v12, %v117_v12  ;;  %p265_p7 = por %p264_p6, %p263_p5 }
  0x50   :  { %v121_v16 = vadd.f32 %v120_v13, %v119_v10 }
  0x51   :  { %v127_v17 = vadd.f32 %v126_v15, %v125_v14  ;;  %p266_p8 = pnand %p265_p7, %p259_p4 }
  0x52   :  { %123 = vst [vmem:[#allocation10] sm:$0xff] %v121_v16 }
  0x53   :  { %129 = vst [vmem:[#allocation11] sm:$0xff] %v127_v17 }
  0x54   :  { %269 = shalt.err (!%p266_p8)
}
  0x55   :  { %s270_s20 = scalar_lea.hbm %s452_s4, 128 }
  0x56   :  { %p271_p9 = scmp.ne.s32.totalorder %s452_s4, %s270_s20  ;;  %p274_p10 = scmp.lt.u32.totalorder %s270_s20, %s452_s4 }
  0x58   :  { %p276_p11 = pnand %p274_p10, %p271_p9 }
  0x5a   :  { %279 = shalt.err (!%p276_p11)
}
  0x5b   :  { %139 = dma.vmem_to_hbm [thread:$0]  %s137_s30, 128, %s452_s4, [#allocation4]  }
  0x5c   :  { %s280_s28 = scalar_lea.vmem %s147_s1, 128  ;;  %p285_p13 = scmp.lt.s32.totalorder %s147_s1, %s147_s1 }
  0x5d   :  { %p281_p12 = scmp.ne.s32.totalorder %s147_s1, %s280_s28  ;;  %p286_p0 = scmp.lt.s32.totalorder %s280_s28, %s280_s28 }
  0x5f   :  { %p287_p1 = por %p286_p0, %p285_p13 }
  0x61   :  { %p288_p2 = pnand %p287_p1, %p281_p12 }
  0x63   :  { %291 = shalt.err (!%p288_p2)
}
  0x64   :  { %s292_s21 = scalar_lea.hbm %s453_s5, 128 }
  0x65   :  { %p293_p3 = scmp.ne.s32.totalorder %s453_s5, %s292_s21  ;;  %p296_p4 = scmp.lt.u32.totalorder %s292_s21, %s453_s5 }
  0x67   :  { %p298_p5 = pnand %p296_p4, %p293_p3 }
  0x69   :  { %301 = shalt.err (!%p298_p5)
}
  0x6a   :  { %149 = dma.vmem_to_hbm [thread:$0]  %s147_s1, 128, %s453_s5, [#allocation12]  }
  0x6b   :  { %308 = dma.done.wait [#allocation4], 128  }
  0x6c   :  { %309 = vsyncadd [#allocation4], 4294967168 }
  0x6d   :  { %310 = dma.done.wait [#allocation12], 128  }
  0x6e   :  { %311 = vsyncadd [#allocation12], 4294967168 }
  0x6f   :  { %156 = vsyncpa [#allocation3], 1 }
  0x70   :  { %157 = vsyncpa [#allocation6], 1 }
  0x71   :  { %158 = vsyncpa [#allocation9], 1 }
  0x72   :  { %159 = vsyncpa [#allocation4], 1 }
  0x73   :  { %160 = vsyncpa [#allocation12], 1 }

</bundles_post_ra>
